<compile_context>
chip_gen: v5e
topology: v5e:2x2
jax: 0.10.0
libtpu: 0.0.40
codegen_flags: <defaults>
</compile_context>

<pallas_src>
import functools

import jax
import jax.numpy as jnp
from jax.experimental import pallas as pl
from jax.experimental.pallas import tpu as pltpu


def _mae_kernel(x_ref, y_ref, o_ref, acc_ref, *, inv_count, n_rows, block_rows,
                mask_rows):
    k = pl.program_id(1)  # reduction axis (inner, "arbitrary")

    @pl.when(k == 0)
    def _():
        acc_ref[...] = jnp.zeros_like(acc_ref)

    x = x_ref[...].astype(jnp.float32)
    y = y_ref[...].astype(jnp.float32)
    a = jnp.abs(x - y)

    if mask_rows:
        # Last row-block may run past n_rows; zero out the padded rows.
        row = k * block_rows + jax.lax.broadcasted_iota(jnp.int32, a.shape, 0)
        a = jnp.where(row < n_rows, a, 0.0)

    acc_ref[...] += jnp.sum(a, axis=0, keepdims=True)

    @pl.when(k == pl.num_programs(1) - 1)
    def _():
        o_ref[...] = (acc_ref[...] * inv_count).astype(o_ref.dtype)


def mae_loss(x, y):
    """x, y: (N, C, H, W). Returns (H, W) float32 tensor matching MAELoss.forward."""
    assert x.shape == y.shape, "x and y must have the same shape"
    N, C, H, W = x.shape
    n_rows = N * C
    L = H * W

    # Free metadata reshape (contiguous NCHW -> row-major (N*C, H*W)).
    x_flat = x.reshape(n_rows, L)
    y_flat = y.reshape(n_rows, L)

    itemsize = jnp.dtype(x.dtype).itemsize

    # Lane tiling: split the lane axis into 2 column tiles when cleanly possible
    # (lets both TensorCores on v7x work in parallel); otherwise one full-width
    # tile (full-extent last dim is always a legal block shape).
    if L % 256 == 0 and L >= 256:
        lane_tiles = 2
        tile_l = L // 2
    else:
        lane_tiles = 1
        tile_l = L

    # Row batching: ~4 MiB per input block. 2 inputs x 2 pipeline buffers
    # -> ~16 MiB VMEM, inside the default scoped limit on v5e/v6e/v7x.
    target_block_bytes = 4 * 1024 * 1024
    sublane = max(8, 32 // itemsize)  # 8 for f32, 16 for bf16, 32 for int8/fp8
    max_rows_by_vmem = max(1, target_block_bytes // (tile_l * itemsize))
    if n_rows <= max_rows_by_vmem:
        block_rows = n_rows  # full extent -> always a legal block shape
    else:
        block_rows = max(sublane, (max_rows_by_vmem // sublane) * sublane)
    reduce_steps = pl.cdiv(n_rows, block_rows)
    mask_rows = (n_rows % block_rows) != 0

    kernel = functools.partial(
        _mae_kernel,
        inv_count=1.0 / float(n_rows),
        n_rows=n_rows,
        block_rows=block_rows,
        mask_rows=mask_rows,
    )

    out = pl.pallas_call(
        kernel,
        out_shape=jax.ShapeDtypeStruct((1, L), jnp.float32),
        grid=(lane_tiles, reduce_steps),
        in_specs=[
            pl.BlockSpec((block_rows, tile_l), lambda j, k: (k, j)),
            pl.BlockSpec((block_rows, tile_l), lambda j, k: (k, j)),
        ],
        out_specs=pl.BlockSpec((1, tile_l), lambda j, k: (0, j)),
        scratch_shapes=[pltpu.VMEM((1, tile_l), jnp.float32)],
        compiler_params=pltpu.CompilerParams(
            dimension_semantics=("parallel", "arbitrary"),
            vmem_limit_bytes=32 * 1024 * 1024,
        ),
    )(x_flat, y_flat)

    return out.reshape(H, W)


if __name__ == "__main__":
    key = jax.random.PRNGKey(0)
    kx, ky = jax.random.split(key)

    N, C, H, W = 2, 4, 16, 16
    x = jax.random.normal(kx, (N, C, H, W), dtype=jnp.float32)
    y = jax.random.normal(ky, (N, C, H, W), dtype=jnp.float32)

    out = mae_loss(x, y)
    out = jax.block_until_ready(out)

    # Reference (plain JAX) check of the PyTorch semantics.
    ref = jnp.abs(x - y).mean(axis=1).mean(axis=0)
    assert out.shape == ref.shape == (H, W)
    assert jnp.allclose(out, ref, atol=1e-5, rtol=1e-5)

    print("KERNEL_OK")
</pallas_src>

<mosaic_0001>
module attributes {stable_mosaic.version = 11 : i64} {
  func.func @_mae_kernel(%arg0: i32, %arg1: i32, %arg2: memref<8x128xf32, #tpu.memory_space<vmem>>, %arg3: memref<8x128xf32, #tpu.memory_space<vmem>>, %arg4: memref<1x128xf32, #tpu.memory_space<vmem>>, %arg5: memref<1x128xf32, #tpu.memory_space<vmem>>) attributes {dimension_semantics = [#tpu.dimension_semantics<parallel>, #tpu.dimension_semantics<arbitrary>], iteration_bounds = array<i64: 2, 1>, scalar_prefetch = 0 : i64, scratch_operands = 1 : i64, tpu.core_type = #tpu.core_type<tc>, window_params = [{transform_indices = @transform_0, window_bounds = array<i64: 8, 128>}, {transform_indices = @transform_1, window_bounds = array<i64: 8, 128>}, {transform_indices = @transform_2, window_bounds = array<i64: 1, 128>}]} {
    %c0_i32 = arith.constant 0 : i32
    %0 = arith.cmpi eq, %arg1, %c0_i32 : i32
    %1 = arith.extui %0 : i1 to i32
    %c0_i32_0 = arith.constant 0 : i32
    %2 = arith.cmpi ne, %1, %c0_i32_0 : i32
    scf.if %2 {
      %cst_10 = arith.constant 0.000000e+00 : f32
      %15 = vector.broadcast %cst_10 : f32 to vector<1x128xf32>
      %c0_11 = arith.constant 0 : index
      %c0_12 = arith.constant 0 : index
      %16 = vector.load %arg5[%c0_11, %c0_12] : memref<1x128xf32, #tpu.memory_space<vmem>>, vector<1x128xf32>
      tpu.vector_store %arg5[%c0_11, %c0_12], %15 {strides = array<i32>} : memref<1x128xf32, #tpu.memory_space<vmem>>, vector<1x128xf32>,
    } else {
    }
    %c0 = arith.constant 0 : index
    %c0_1 = arith.constant 0 : index
    %3 = vector.load %arg2[%c0, %c0_1] : memref<8x128xf32, #tpu.memory_space<vmem>>, vector<8x128xf32>
    %c0_2 = arith.constant 0 : index
    %c0_3 = arith.constant 0 : index
    %4 = vector.load %arg3[%c0_2, %c0_3] : memref<8x128xf32, #tpu.memory_space<vmem>>, vector<8x128xf32>
    %5 = arith.subf %3, %4 : vector<8x128xf32>
    %6 = math.absf %5 : vector<8x128xf32>
    %c0_4 = arith.constant 0 : index
    %c0_5 = arith.constant 0 : index
    %7 = vector.load %arg5[%c0_4, %c0_5] : memref<1x128xf32, #tpu.memory_space<vmem>>, vector<1x128xf32>
    %cst = arith.constant dense<0.000000e+00> : vector<128xf32>
    %8 = vector.multi_reduction <add>, %6, %cst [0] : vector<8x128xf32> to vector<128xf32>
    %9 = vector.shape_cast %8 : vector<128xf32> to vector<1x128xf32>
    %10 = arith.addf %7, %9 : vector<1x128xf32>
    %c0_6 = arith.constant 0 : index
    %c0_7 = arith.constant 0 : index
    %11 = vector.load %arg5[%c0_6, %c0_7] : memref<1x128xf32, #tpu.memory_space<vmem>>, vector<1x128xf32>
    tpu.vector_store %arg5[%c0_6, %c0_7], %10 {strides = array<i32>} : memref<1x128xf32, #tpu.memory_space<vmem>>, vector<1x128xf32>,
    %c0_i32_8 = arith.constant 0 : i32
    %12 = arith.cmpi eq, %arg1, %c0_i32_8 : i32
    %13 = arith.extui %12 : i1 to i32
    %c0_i32_9 = arith.constant 0 : i32
    %14 = arith.cmpi ne, %13, %c0_i32_9 : i32
    scf.if %14 {
      %c0_10 = arith.constant 0 : index
      %c0_11 = arith.constant 0 : index
      %15 = vector.load %arg5[%c0_10, %c0_11] : memref<1x128xf32, #tpu.memory_space<vmem>>, vector<1x128xf32>
      %cst_12 = arith.constant 1.250000e-01 : f32
      %16 = vector.broadcast %cst_12 : f32 to vector<1x128xf32>
      %17 = arith.mulf %15, %16 : vector<1x128xf32>
      %c0_13 = arith.constant 0 : index
      %c0_14 = arith.constant 0 : index
      %18 = vector.load %arg4[%c0_13, %c0_14] : memref<1x128xf32, #tpu.memory_space<vmem>>, vector<1x128xf32>
      tpu.vector_store %arg4[%c0_13, %c0_14], %17 {strides = array<i32>} : memref<1x128xf32, #tpu.memory_space<vmem>>, vector<1x128xf32>,
    } else {
    }
    return
  }
  func.func @transform_0(%arg0: i32, %arg1: i32) -> (i32, i32) {
    %c0_i32 = arith.constant 0 : i32
    return %arg1, %arg0 : i32, i32
  }
  func.func @transform_1(%arg0: i32, %arg1: i32) -> (i32, i32) {
    %c0_i32 = arith.constant 0 : i32
    return %arg1, %arg0 : i32, i32
  }
  func.func @transform_2(%arg0: i32, %arg1: i32) -> (i32, i32) {
    %c0_i32 = arith.constant 0 : i32
    %c0_i32_0 = arith.constant 0 : i32
    return %c0_i32, %arg0 : i32, i32
  }
}

</mosaic_0001>

<bundles_post_ra>
// kernel: tpu_custom_call.1
= control target key start
LH: loop header
LB: loop body
LE: loop exit
PB: predicated region body
PF: predicated region fallthrough
CT: control target
= control target key end

     0   :  { %7 = vsyncpa [#allocation4], 0  ;;  %s731_s0 = inlined_call_operand.hbm [shape: f32[8,256], index: 0, kind: input, shape index: {}]   ;;  %s732_s1 = inlined_call_operand.hbm [shape: f32[8,256], index: 1, kind: input, shape index: {}]   ;;  %s733_s2 = inlined_call_operand.hbm [shape: f32[1,256], index: 2, kind: output, shape index: {}]  }
   0x1   :  { %9 = vsyncpa [#allocation4 + $0x1], 0 }
   0x2   :  { %10 = vsyncpa [#allocation7], 0 }
   0x3   :  { %12 = vsyncpa [#allocation7 + $0x1], 0 }
   0x4   :  { %13 = vsyncpa [#allocation5], 0 }
   0x5   :  { %15 = vsyncpa [#allocation5 + $0x1], 0  ;;  %s602_s9 = smov 0   ;;  %s604_s10 = smov 0  }
   0x6   :  { %s606_s11 = smov 0   ;;  %s608_s12 = smov 0  }
   0x7   :  { %s610_s13 = smov 0   ;;  %s612_s14 = smov 0  }
   0x8 LB: > { %s357_s15 = sadd.s32 4294967295, %s584_s14   ;;  %s358_s16 = sadd.s32 4294967294, %s584_s14   ;;  %s584_s14 = sphi %s612_s14, %s21_s14   ;;  %s580_s13 = sphi %s610_s13, %s742_s13   ;;  %s576_s12 = sphi %s608_s12, %s741_s12   ;;  %s572_s11 = sphi %s606_s11, %s740_s11   ;;  %s568_s10 = sphi %s604_s10, %s739_s10   ;;  %s564_s9 = sphi %s602_s9, %s738_s9  }
   0x9   : > { %s33_s17 = sadd.s32 1, %s580_s13  ;;  %s42_s18 = sadd.s32 1, %s572_s11 }
   0xa   : > { %p35_p0 = scmp.ge.s32.totalorder %s33_s17, 2  ;;  %p49_p1 = scmp.ne.s32.totalorder %s572_s11, %s568_s10 }
   0xb   : > { %p50_p2 = scmp.eq.s32.totalorder %s584_s14, 0  ;;  %p55_p3 = scmp.ne.s32.totalorder %s568_s10, %s564_s9 }
   0xc   : > { %s744_s17 = smov (%p35_p0, %s33_s17), 0  ;;  %p56_p5 = scmp.eq.s32.totalorder %s357_s15, 0 }
   0xd   : > { %p643_p4 = por %p50_p2, %p49_p1  ;;  %s38_s20 = ssub.s32 %s580_s13, %s744_s17 }
   0xe   : > { %p107_p6 = scmp.eq.s32.totalorder %s357_s15, 1  ;;  %p40_p7 = scmp.eq.s32.totalorder %s38_s20, 0 }
   0xf   : > { %p649_p8 = por %p56_p5, %p55_p3  ;;  %p113_p10 = scmp.eq.s32.totalorder %s358_s16, 1 }
  0x10   : > { %p653_p9 = por %p107_p6, %p49_p1  ;;  %p360_p12 = scmp.ge.s32.totalorder %s584_s14, 2 }
  0x11   : > { %s658_s23 = scalar_select %p40_p7, %s572_s11, %s42_s18  }
  0x12   : > { %p660_p11 = por %p113_p10, %p55_p3  ;;  %p387_p13 = scmp.lt.s32.totalorder %s584_s14, 2 }
  0x13   : > { %s133_s25 = sand.u32 1, %s572_s11   ;;  %s362_s27 = sshll.u32 %s580_s13, 3 }
  0x14   : > { %s361_s26 = sshll.u32 %s133_s25, 3  ;;  %s143_s30 = scalar_lea.hbm %s731_s0, %s362_s27 }
  0x15   : > { %s137_s3 = scalar_lea.vmem [#allocation3], %s361_s26  ;;  %s145_s5 = sshll.u32 %s143_s30, 4  ;;  %s146_s5 = int_to_ptr.hbm [resolvable:$true] %s145_s5 }
  0x16   : > { %s147_s4 = sshll.u32 %s137_s3, 4  ;;  %p377_p0 = pnand %p387_p13, %p643_p4  ;;  %s148_s4 = int_to_ptr.vmem [resolvable:$true] %s147_s4 }
  0x17   : > { %p365_p1 = scmp.ge.s32.totalorder %s584_s14, 1  ;;  %p173_p2 = scmp.lt.s32.totalorder %s584_s14, 3 }
  0x18   : > { %s134_s6 = scalar_lea.sflag [#allocation4], %s133_s25  ;;  %s164_s15 = scalar_lea.hbm %s732_s1, %s362_s27 }
  0x19   : > { %379 = dma.hbm_to_vmem [thread:$0]  (!%p377_p0), %s146_s5, 128, %s148_s4, %s134_s6  }
  0x1a   : > { %p174_p3 = pnand %p365_p1, %p173_p2  ;;  %s158_s16 = scalar_lea.vmem [#allocation6], %s361_s26 }
  0x1b   : > { %s168_s18 = sshll.u32 %s158_s16, 4  ;;  %s166_s20 = sshll.u32 %s164_s15, 4  ;;  %s169_s18 = int_to_ptr.vmem [resolvable:$true] %s168_s18  ;;  %s167_s20 = int_to_ptr.hbm [resolvable:$true] %s166_s20 }
  0x1c   : > { %s155_s28 = scalar_lea.sflag [#allocation7], %s133_s25  ;;  %177 = sbr.rel (%p174_p3) target bundleno = 68 (0x44), region = 28 }
  0x1d   : > { %382 = dma.hbm_to_vmem [thread:$0]  (!%p377_p0), %s167_s20, 128, %s169_s18, %s155_s28  }
  0x1e   : > { %s679_s19 = sand.u32 (!%p174_p3), 1, %s568_s10  }
  0x1f   : > { %s366_s29 = sshll.u32 (!%p174_p3), %s679_s19, 3  ;;  %s180_s30 = scalar_lea.sflag (!%p174_p3), [#allocation4], %s679_s19 }
  0x20   : > { %s183_s3 = scalar_lea.vmem (!%p174_p3), [#allocation3], %s366_s29 }
  0x21   : > { %551 = dma.done.wait (%p649_p8), %s180_s30, 128  }
  0x22   : > { %553 = vsyncadd (%p649_p8), %s180_s30, 4294967168  ;;  %s190_s26 = scalar_lea.sflag [#allocation7], %s679_s19  ;;  %s193_s25 = scalar_lea.vmem [#allocation6], %s366_s29 }
  0x23   : > { %555 = dma.done.wait (%p649_p8), %s190_s26, 128  }
  0x24   : > { %557 = vsyncadd (%p649_p8), %s190_s26, 4294967168  ;;  %v586_v0 = vmov 0.0   ;;  %v224_v1 = vld [vmem:[%s183_s3] sm:$0xff]  ;;  %v225_v2 = vld [vmem:[%s193_s25] sm:$0xff]  ;;  %s252_s4 = scalar_lea.hbm %s733_s2, %s576_s12  ;;  %s218_s5 = scalar_lea.vmem [#allocation8], %s679_s19 }
  0x25   : > { %223 = vst [vmem:[#allocation2] sm:$0x1] %v586_v0  ;;  %v226_v3 = vsub.f32 %v224_v1, %v225_v2  ;;  %s254_s6 = sshll.u32 %s218_s5, 4  ;;  %s256_s7 = sshll.u32 %s252_s4, 4  ;;  %s255_s6 = int_to_ptr.vmem [resolvable:$true] %s254_s6  ;;  %s257_s7 = int_to_ptr.hbm [resolvable:$true] %s256_s7 }
  0x26   : > { %s244_s8 = scalar_lea.sflag [#allocation5], %s679_s19  ;;  %s512_s15 = sshra.s32 %s257_s7, 4  ;;  %s513_s15 = int_to_ptr.hbm [resolvable:$true] %s512_s15 }
  0x27   : > { %v227_v4 = vand.u32 2147483647, %v226_v3  ;;  %s514_s16 = scalar_lea.hbm %s513_s15, 1  ;;  %s518_s12 = scalar_lea.hbm %s733_s2, 2 }
  0x28   : > { %p515_p4 = scmp.ne.s32.totalorder %s513_s15, %s514_s16  ;;  %p519_p7 = scmp.lt.s32.totalorder %s513_s15, %s733_s2 }
  0x29   : > { %v229_v5 = vrot.slane %v227_v4, 4  ;;  %p520_p8 = scmp.lt.s32.totalorder %s518_s12, %s514_s16 }
  0x2a   : > { %p516_p5 = pnand %p515_p4, %p653_p9 }
  0x2b   : > { %v230_v6 = vadd.f32 %v229_v5, %v227_v4  ;;  %p521_p10 = por %p520_p8, %p519_p7 }
  0x2c   : > { %v228_v10 = vld [vmem:[#allocation2] sm:$0x1]  ;;  %p517_p6 = pneg %p516_p5 }
  0x2d   : > { %v231_v7 = vrot.slane %v230_v6, 2 }
  0x2e   : > { %p522_p13 = pnand %p521_p10, %p517_p6 }
  0x2f   : > { %v232_v8 = vadd.f32 %v231_v7, %v230_v6 }
  0x31   : > { %v233_v9 = vrot.slane %v232_v8, 1 }
  0x33   : > { %v234_v11 = vadd.f32 %v233_v9, %v232_v8 }
  0x35   : > { %v235_v12 = vadd.f32 %v234_v11, %v228_v10 }
  0x37   : > { %236 = vst [vmem:[#allocation2] sm:$0x1] %v235_v12 }
  0x3e   : > { %v240_v13 = vld [vmem:[#allocation2] sm:$0x1] }
  0x3f   : > { %v241_v14 = vmul.f32 0.125, %v240_v13 }
  0x41   : > { %242 = vst [vmem:[%s218_s5] sm:$0x1] %v241_v14 }
  0x42   : > { %525 = shalt.err (!%p522_p13)
}
  0x43   : > { %374 = dma.vmem_to_hbm [thread:$0]  (%p653_p9), %s255_s6, 16, %s257_s7, %s244_s8  }
  0x44 PF: > { %s268_s19 = sand.u32 1, %s564_s9   ;;  %p384_p0 = pnand %p360_p12, %p660_p11 }
  0x45   : > { %s269_s30 = scalar_lea.sflag [#allocation5], %s268_s19 }
  0x46   : > { %p385_p1 = pneg %p384_p0 }
  0x48   : > { %559 = dma.done.wait (%p385_p1), %s269_s30, 16  }
  0x49   : > { %561 = vsyncadd (%p385_p1), %s269_s30, 4294967280  ;;  %s21_s14 = sadd.s32 1, %s584_s14   ;;  %s738_s9 = smov %s568_s10 }
  0x4a   : > { %p18_p2 = scmp.ge.s32.totalorder %s21_s14, 4   ;;  %s739_s10 = smov %s572_s11 }
  0x4b   : > { %s740_s11 = smov %s658_s23  ;;  %s741_s12 = smov %s580_s13 }
  0x4c   : > { %s742_s13 = smov %s744_s17  ;;  %20 = sbr.rel (!%p18_p2) target bundleno = 8 (0x8), region = 94 }
  0x51   :  { %274 = vsyncpa [#allocation4], 1 }
  0x52   :  { %276 = vsyncpa [#allocation4 + $0x1], 1 }
  0x53   :  { %277 = vsyncpa [#allocation7], 1 }
  0x54   :  { %279 = vsyncpa [#allocation7 + $0x1], 1 }
  0x55   :  { %280 = vsyncpa [#allocation5], 1 }
  0x56   :  { %282 = vsyncpa [#allocation5 + $0x1], 1 }

</bundles_post_ra>
